<compile_context>
chip_gen: v7x
topology: tpu7x:2x2x1
jax: 0.10.0
libtpu: 0.0.40
codegen_flags: <defaults>
</compile_context>

<pallas_src>
import jax
import jax.numpy as jnp
from jax.experimental import pallas as pl
from jax.experimental.pallas import tpu as pltpu


def _conv1x1_bn_add_kernel(w_ref, b_ref, x_ref, r_ref, o_ref):
    # w_ref: (Cout, Cin)   BN-scale-folded 1x1 conv weight
    # b_ref: (Cout, 1)     folded BN bias = beta - mean * scale
    # x_ref: (Cin, R)      channel-major input pixels  (batch dim squeezed)
    # r_ref: (Cout, R)     residual (x110), channel-major
    # o_ref: (Cout, R)
    y = jnp.dot(w_ref[...], x_ref[...], preferred_element_type=jnp.float32)
    o_ref[...] = (y + b_ref[...] + r_ref[...]).astype(o_ref.dtype)


def conv1x1_bn_add(x117, x110, weight, gamma, beta, running_mean, running_var,
                   eps=1e-3):
    """x117: (N, Cin, H, W), x110: (N, Cout, H, W), weight: (Cout, Cin, 1, 1)."""
    N, Cin, H, W = x117.shape
    Cout = weight.shape[0]
    R = H * W

    # Free views of the NCHW tensors (no transposes).
    x = x117.reshape(N, Cin, R)
    res = x110.reshape(N, Cout, R)

    # Fold eval-mode BN into the weight / a per-channel bias (tiny one-time XLA ops).
    w_mat = weight.reshape(Cout, Cin).astype(jnp.float32)
    scale = (gamma / jnp.sqrt(running_var + eps)).astype(jnp.float32)
    w_scaled = w_mat * scale[:, None]                               # (Cout, Cin)
    bias = (beta - running_mean * scale).reshape(Cout, 1).astype(jnp.float32)

    out = pl.pallas_call(
        _conv1x1_bn_add_kernel,
        out_shape=jax.ShapeDtypeStruct((N, Cout, R), x117.dtype),
        grid=(N,),
        in_specs=[
            pl.BlockSpec((Cout, Cin), lambda n: (0, 0)),      # weight, resident
            pl.BlockSpec((Cout, 1), lambda n: (0, 0)),        # bias, resident
            pl.BlockSpec((None, Cin, R), lambda n: (n, 0, 0)),   # x, batch squeezed
            pl.BlockSpec((None, Cout, R), lambda n: (n, 0, 0)),  # residual
        ],
        out_specs=pl.BlockSpec((None, Cout, R), lambda n: (n, 0, 0)),
        compiler_params=pltpu.CompilerParams(
            dimension_semantics=("parallel",)),
    )(w_scaled, bias, x, res)

    # Free view back to NCHW.
    return out.reshape(N, Cout, H, W)


if __name__ == "__main__":
    key = jax.random.PRNGKey(0)
    k1, k2, k3, k4, k5, k6, k7 = jax.random.split(key, 7)

    N, Cin, Cout, H, W = 1, 384, 64, 14, 14

    # Inputs (match the module's shapes).
    x117 = jax.random.normal(k1, (N, Cin, H, W), dtype=jnp.float32)
    x110 = jax.random.normal(k2, (N, Cout, H, W), dtype=jnp.float32)

    # Deterministic parameters.
    weight = 0.05 * jax.random.normal(k3, (Cout, Cin, 1, 1), dtype=jnp.float32)
    gamma = 1.0 + 0.1 * jax.random.normal(k4, (Cout,), dtype=jnp.float32)
    beta = 0.1 * jax.random.normal(k5, (Cout,), dtype=jnp.float32)
    running_mean = 0.1 * jax.random.normal(k6, (Cout,), dtype=jnp.float32)
    running_var = jax.random.uniform(k7, (Cout,), dtype=jnp.float32,
                                     minval=0.5, maxval=1.5)

    out = conv1x1_bn_add(x117, x110, weight, gamma, beta,
                         running_mean, running_var, eps=1e-3)
    jax.block_until_ready(out)

    # Reference check in plain JAX (eval-mode BN).
    y_ref = jnp.einsum('oc,nchw->nohw', weight.reshape(Cout, Cin), x117)
    s = gamma / jnp.sqrt(running_var + 1e-3)
    b = beta - running_mean * s
    y_ref = y_ref * s[None, :, None, None] + b[None, :, None, None] + x110

    assert out.shape == (N, Cout, H, W)
    assert jnp.allclose(out, y_ref, atol=1e-4, rtol=1e-4), "mismatch vs reference"

    print("KERNEL_OK")
</pallas_src>

<mosaic_0001>
module attributes {stable_mosaic.version = 11 : i64} {
  func.func @_conv1x1_bn_add_kernel(%arg0: i32, %arg1: memref<64x384xf32, #tpu.memory_space<vmem>>, %arg2: memref<64x1xf32, #tpu.memory_space<vmem>>, %arg3: memref<1x384x196xf32, #tpu.memory_space<vmem>>, %arg4: memref<1x64x196xf32, #tpu.memory_space<vmem>>, %arg5: memref<1x64x196xf32, #tpu.memory_space<vmem>>) attributes {dimension_semantics = [#tpu.dimension_semantics<parallel>], iteration_bounds = array<i64: 1>, scalar_prefetch = 0 : i64, scratch_operands = 0 : i64, tpu.core_type = #tpu.core_type<tc>, window_params = [{pipeline_mode = #tpu.pipeline_mode<synchronous>, transform_indices = @transform_0, window_bounds = array<i64: 64, 384>}, {pipeline_mode = #tpu.pipeline_mode<synchronous>, transform_indices = @transform_1, window_bounds = array<i64: 64, 1>}, {transform_indices = @transform_2, window_bounds = array<i64: 1, 384, 196>}, {transform_indices = @transform_3, window_bounds = array<i64: 1, 64, 196>}, {transform_indices = @transform_4, window_bounds = array<i64: 1, 64, 196>}]} {
    %c0 = arith.constant 0 : index
    %c0_0 = arith.constant 0 : index
    %0 = vector.load %arg1[%c0, %c0_0] : memref<64x384xf32, #tpu.memory_space<vmem>>, vector<64x384xf32>
    %c0_1 = arith.constant 0 : index
    %c0_2 = arith.constant 0 : index
    %c0_3 = arith.constant 0 : index
    %1 = vector.load %arg3[%c0_1, %c0_2, %c0_3] : memref<1x384x196xf32, #tpu.memory_space<vmem>>, vector<1x384x196xf32>
    %2 = vector.shape_cast %1 : vector<1x384x196xf32> to vector<384x196xf32>
    %cst = arith.constant dense<0.000000e+00> : vector<64x196xf32>
    %3 = tpu.matmul %0, %2, %cst {dimension_numbers = #tpu.dot_dimension_numbers<[1], [0], [0], [1], [0, 0, 1, 1], [], []>} : vector<64x384xf32>, vector<384x196xf32>, vector<64x196xf32> -> vector<64x196xf32>
    %c0_4 = arith.constant 0 : index
    %c0_5 = arith.constant 0 : index
    %4 = vector.load %arg2[%c0_4, %c0_5] : memref<64x1xf32, #tpu.memory_space<vmem>>, vector<64x1xf32>
    %5 = vector.broadcast %4 : vector<64x1xf32> to vector<64x196xf32>
    %6 = arith.addf %3, %5 : vector<64x196xf32>
    %c0_6 = arith.constant 0 : index
    %c0_7 = arith.constant 0 : index
    %c0_8 = arith.constant 0 : index
    %7 = vector.load %arg4[%c0_6, %c0_7, %c0_8] : memref<1x64x196xf32, #tpu.memory_space<vmem>>, vector<1x64x196xf32>
    %8 = vector.shape_cast %7 : vector<1x64x196xf32> to vector<64x196xf32>
    %9 = arith.addf %6, %8 : vector<64x196xf32>
    %c0_9 = arith.constant 0 : index
    %c0_10 = arith.constant 0 : index
    %c0_11 = arith.constant 0 : index
    %10 = vector.load %arg5[%c0_9, %c0_10, %c0_11] : memref<1x64x196xf32, #tpu.memory_space<vmem>>, vector<1x64x196xf32>
    %11 = vector.shape_cast %10 : vector<1x64x196xf32> to vector<64x196xf32>
    %12 = vector.shape_cast %9 : vector<64x196xf32> to vector<1x64x196xf32>
    tpu.vector_store %arg5[%c0_9, %c0_10, %c0_11], %12 {strides = array<i32>} : memref<1x64x196xf32, #tpu.memory_space<vmem>>, vector<1x64x196xf32>,
    return
  }
  func.func @transform_0(%arg0: i32) -> (i32, i32) {
    %c0_i32 = arith.constant 0 : i32
    %c0_i32_0 = arith.constant 0 : i32
    %c0_i32_1 = arith.constant 0 : i32
    return %c0_i32, %c0_i32_0 : i32, i32
  }
  func.func @transform_1(%arg0: i32) -> (i32, i32) {
    %c0_i32 = arith.constant 0 : i32
    %c0_i32_0 = arith.constant 0 : i32
    %c0_i32_1 = arith.constant 0 : i32
    return %c0_i32, %c0_i32_0 : i32, i32
  }
  func.func @transform_2(%arg0: i32) -> (i32, i32, i32) {
    %c0_i32 = arith.constant 0 : i32
    %c0_i32_0 = arith.constant 0 : i32
    %c0_i32_1 = arith.constant 0 : i32
    return %arg0, %c0_i32, %c0_i32_0 : i32, i32, i32
  }
  func.func @transform_3(%arg0: i32) -> (i32, i32, i32) {
    %c0_i32 = arith.constant 0 : i32
    %c0_i32_0 = arith.constant 0 : i32
    %c0_i32_1 = arith.constant 0 : i32
    return %arg0, %c0_i32, %c0_i32_0 : i32, i32, i32
  }
  func.func @transform_4(%arg0: i32) -> (i32, i32, i32) {
    %c0_i32 = arith.constant 0 : i32
    %c0_i32_0 = arith.constant 0 : i32
    %c0_i32_1 = arith.constant 0 : i32
    return %arg0, %c0_i32, %c0_i32_0 : i32, i32, i32
  }
}

</mosaic_0001>

<bundles_post_ra>
// kernel: tpu_custom_call.1
= control target key start
LH: loop header
LB: loop body
LE: loop exit
PB: predicated region body
PF: predicated region fallthrough
CT: control target
= control target key end

     0   :  { %v636_v7 = vmov 0.0   ;;  %v637_v8 = vmov 0   ;;  %s1150_s0 = inlined_call_operand.vmem [shape: f32[64,384], index: 0, kind: input, shape index: {}]   ;;  %s1151_s1 = inlined_call_operand.vmem [shape: f32[64,1], index: 1, kind: input, shape index: {}]   ;;  %s1152_s2 = inlined_call_operand.vmem [shape: f32[1,384,196], index: 2, kind: input, shape index: {}]   ;;  %s1153_s3 = inlined_call_operand.vmem [shape: f32[1,64,196], index: 3, kind: input, shape index: {}]   ;;  %s1154_s4 = inlined_call_operand.hbm [shape: f32[1,64,196], index: 4, kind: output, shape index: {}]  }
   0x1   :  { %v43_v0 = vld [vmem:[%s1152_s2 + $0x8] sm:$0xff]  ;;  %v45_v1 = vld [vmem:[%s1152_s2 + $0x18] sm:$0xff]  ;;  %v42_v2 = vld [vmem:[%s1152_s2] sm:$0xff]  ;;  %363 = vmatprep.mubr.f32.mxu0 %v636_v7  ;;  %610 = vset.pattern.permute.xlu0 %v637_v8 }
   0x2   :  { %v477_v3 = vpack.c.bf16 %v45_v1, %v43_v0  ;;  %v44_v4 = vld [vmem:[%s1152_s2 + $0x10] sm:$0xff]  ;;  %v47_v5 = vld [vmem:[%s1152_s2 + $0x28] sm:$0xff]  ;;  %v49_v6 = vld [vmem:[%s1152_s2 + $0x38] sm:$0xff]  ;;  %611 = vset.pattern.permute.xlu1 %v637_v8 }
   0x3   :  { %v479_v9 = vpack.c.bf16 %v44_v4, %v42_v2  ;;  %v481_v10 = vpack.c.bf16 %v49_v6, %v47_v5  ;;  %v46_v11 = vld [vmem:[%s1152_s2 + $0x20] sm:$0xff]  ;;  %v48_v12 = vld [vmem:[%s1152_s2 + $0x30] sm:$0xff]  ;;  %v51_v13 = vld [vmem:[%s1152_s2 + $0x48] sm:$0xff] }
   0x4   :  { %478 = vmatprep.subr.bf16.mxu1 %v477_v3  ;;  %v53_v14 = vld [vmem:[%s1152_s2 + $0x58] sm:$0xff]  ;;  %v483_v15 = vpack.c.bf16 %v48_v12, %v46_v11  ;;  %v50_v17 = vld [vmem:[%s1152_s2 + $0x40] sm:$0xff]  ;;  %v52_v18 = vld [vmem:[%s1152_s2 + $0x50] sm:$0xff] }
   0x5   :  { %480 = vmatpush1.bf16.msra.mxu1 %v479_v9  ;;  %v485_v16 = vpack.c.bf16 %v53_v14, %v51_v13  ;;  %v55_v19 = vld [vmem:[%s1152_s2 + $0x68] sm:$0xff]  ;;  %v57_v20 = vld [vmem:[%s1152_s2 + $0x78] sm:$0xff]  ;;  %v487_v21 = vpack.c.bf16 %v52_v18, %v50_v17  ;;  %v54_v23 = vld [vmem:[%s1152_s2 + $0x60] sm:$0xff] }
   0x6   :  { %482 = vmatprep.subr.bf16.mxu1 %v481_v10  ;;  %v489_v22 = vpack.c.bf16 %v57_v20, %v55_v19  ;;  %v56_v24 = vld [vmem:[%s1152_s2 + $0x70] sm:$0xff]  ;;  %v59_v25 = vld [vmem:[%s1152_s2 + $0x88] sm:$0xff]  ;;  %v61_v26 = vld [vmem:[%s1152_s2 + $0x98] sm:$0xff] }
   0x7   :  { %v491_v27 = vpack.c.bf16 %v56_v24, %v54_v23  ;;  %v107_v28 = vld [vmem:[%s1152_s2 + $0x208] sm:$0xff]  ;;  %v109_v29 = vld [vmem:[%s1152_s2 + $0x218] sm:$0xff]  ;;  %v106_v30 = vld [vmem:[%s1152_s2 + $0x200] sm:$0xff]  ;;  %v493_v31 = vpack.c.bf16 %v61_v26, %v59_v25 }
   0x8   :  { %v58_v32 = vld [vmem:[%s1152_s2 + $0x80] sm:$0xff]  ;;  %v60_v33 = vld [vmem:[%s1152_s2 + $0x90] sm:$0xff]  ;;  %v541_v34 = vpack.c.bf16 %v109_v29, %v107_v28  ;;  %v63_v36 = vld [vmem:[%s1152_s2 + $0xa8] sm:$0xff] }
   0x9   :  { %484 = vmatpush1.bf16.msra.mxu1 %v483_v15  ;;  %v108_v35 = vld [vmem:[%s1152_s2 + $0x210] sm:$0xff]  ;;  %v65_v37 = vld [vmem:[%s1152_s2 + $0xb8] sm:$0xff]  ;;  %v111_v39 = vld [vmem:[%s1152_s2 + $0x228] sm:$0xff]  ;;  %v495_v43 = vpack.c.bf16 %v60_v33, %v58_v32 }
   0xa   :  { %486 = vmatprep.subr.bf16.mxu1 %v485_v16  ;;  %v543_v38 = vpack.c.bf16 %v108_v35, %v106_v30  ;;  %542 = vmatprep.subr.bf16.mxu0 %v541_v34  ;;  %v113_v40 = vld [vmem:[%s1152_s2 + $0x238] sm:$0xff]  ;;  %v110_v41 = vld [vmem:[%s1152_s2 + $0x220] sm:$0xff]  ;;  %v112_v42 = vld [vmem:[%s1152_s2 + $0x230] sm:$0xff]  ;;  %v497_v48 = vpack.c.bf16 %v65_v37, %v63_v36 }
   0xb   :  { %v62_v44 = vld [vmem:[%s1152_s2 + $0xa0] sm:$0xff]  ;;  %v64_v45 = vld [vmem:[%s1152_s2 + $0xb0] sm:$0xff]  ;;  %v545_v46 = vpack.c.bf16 %v113_v40, %v111_v39  ;;  %v547_v47 = vpack.c.bf16 %v112_v42, %v110_v41  ;;  %v67_v49 = vld [vmem:[%s1152_s2 + $0xc8] sm:$0xff] }
   0xc   :  { %544 = vmatpush1.bf16.msra.mxu0 %v543_v38  ;;  %v115_v50 = vld [vmem:[%s1152_s2 + $0x248] sm:$0xff]  ;;  %v117_v51 = vld [vmem:[%s1152_s2 + $0x258] sm:$0xff]  ;;  %v114_v54 = vld [vmem:[%s1152_s2 + $0x240] sm:$0xff]  ;;  %v499_v56 = vpack.c.bf16 %v64_v45, %v62_v44 }
   0xd   :  { %488 = vmatpush1.bf16.msra.mxu1 %v487_v21  ;;  %v69_v52 = vld [vmem:[%s1152_s2 + $0xd8] sm:$0xff]  ;;  %546 = vmatprep.subr.bf16.mxu0 %v545_v46  ;;  %v549_v53 = vpack.c.bf16 %v117_v51, %v115_v50  ;;  %v116_v55 = vld [vmem:[%s1152_s2 + $0x250] sm:$0xff]  ;;  %v66_v57 = vld [vmem:[%s1152_s2 + $0xc0] sm:$0xff] }
   0xe   :  { %490 = vmatprep.subr.bf16.mxu1 %v489_v22  ;;  %v551_v58 = vpack.c.bf16 %v116_v55, %v114_v54  ;;  %v119_v59 = vld [vmem:[%s1152_s2 + $0x268] sm:$0xff]  ;;  %v121_v60 = vld [vmem:[%s1152_s2 + $0x278] sm:$0xff]  ;;  %v501_v61 = vpack.c.bf16 %v69_v52, %v67_v49  ;;  %v68_v62 = vld [vmem:[%s1152_s2 + $0xd0] sm:$0xff] }
   0xf   :  { %v553_v63 = vpack.c.bf16 %v121_v60, %v119_v59  ;;  %v118_v0 = vld [vmem:[%s1152_s2 + $0x260] sm:$0xff]  ;;  %v120_v1 = vld [vmem:[%s1152_s2 + $0x270] sm:$0xff]  ;;  %v71_v2 = vld [vmem:[%s1152_s2 + $0xe8] sm:$0xff]  ;;  %v503_v6 = vpack.c.bf16 %v68_v62, %v66_v57 }
  0x10   :  { %548 = vmatpush1.bf16.msra.mxu0 %v547_v47  ;;  %v73_v3 = vld [vmem:[%s1152_s2 + $0xf8] sm:$0xff]  ;;  %v123_v4 = vld [vmem:[%s1152_s2 + $0x288] sm:$0xff]  ;;  %v70_v8 = vld [vmem:[%s1152_s2 + $0xe0] sm:$0xff]  ;;  %v555_v10 = vpack.c.bf16 %v120_v1, %v118_v0 }
  0x11   :  { %492 = vmatpush1.bf16.msra.mxu1 %v491_v27  ;;  %550 = vmatprep.subr.bf16.mxu0 %v549_v53  ;;  %v125_v5 = vld [vmem:[%s1152_s2 + $0x298] sm:$0xff]  ;;  %v72_v9 = vld [vmem:[%s1152_s2 + $0xf0] sm:$0xff]  ;;  %v505_v11 = vpack.c.bf16 %v73_v3, %v71_v2  ;;  %v75_v12 = vld [vmem:[%s1152_s2 + $0x108] sm:$0xff] }
  0x12   :  { %494 = vmatprep.subr.bf16.mxu1 %v493_v31  ;;  %v557_v13 = vpack.c.bf16 %v125_v5, %v123_v4  ;;  %v122_v14 = vld [vmem:[%s1152_s2 + $0x280] sm:$0xff]  ;;  %v124_v15 = vld [vmem:[%s1152_s2 + $0x290] sm:$0xff]  ;;  %v77_v16 = vld [vmem:[%s1152_s2 + $0x118] sm:$0xff]  ;;  %v507_v19 = vpack.c.bf16 %v72_v9, %v70_v8 }
  0x13   :  { %v127_v17 = vld [vmem:[%s1152_s2 + $0x2a8] sm:$0xff]  ;;  %v129_v18 = vld [vmem:[%s1152_s2 + $0x2b8] sm:$0xff]  ;;  %v74_v20 = vld [vmem:[%s1152_s2 + $0x100] sm:$0xff]  ;;  %v559_v22 = vpack.c.bf16 %v124_v15, %v122_v14  ;;  %v509_v23 = vpack.c.bf16 %v77_v16, %v75_v12 }
  0x14   :  { %552 = vmatpush1.bf16.msra.mxu0 %v551_v58  ;;  %v76_v21 = vld [vmem:[%s1152_s2 + $0x110] sm:$0xff]  ;;  %v79_v24 = vld [vmem:[%s1152_s2 + $0x128] sm:$0xff]  ;;  %v561_v25 = vpack.c.bf16 %v129_v18, %v127_v17  ;;  %v126_v26 = vld [vmem:[%s1152_s2 + $0x2a0] sm:$0xff] }
  0x15   :  { %496 = vmatpush1.bf16.msra.mxu1 %v495_v43  ;;  %554 = vmatprep.subr.bf16.mxu0 %v553_v63  ;;  %v128_v27 = vld [vmem:[%s1152_s2 + $0x2b0] sm:$0xff]  ;;  %v81_v28 = vld [vmem:[%s1152_s2 + $0x138] sm:$0xff]  ;;  %v131_v29 = vld [vmem:[%s1152_s2 + $0x2c8] sm:$0xff]  ;;  %v511_v31 = vpack.c.bf16 %v76_v21, %v74_v20 }
  0x16   :  { %498 = vmatprep.subr.bf16.mxu1 %v497_v48  ;;  %v133_v30 = vld [vmem:[%s1152_s2 + $0x2d8] sm:$0xff]  ;;  %v78_v32 = vld [vmem:[%s1152_s2 + $0x120] sm:$0xff]  ;;  %v80_v33 = vld [vmem:[%s1152_s2 + $0x130] sm:$0xff]  ;;  %v563_v34 = vpack.c.bf16 %v128_v27, %v126_v26  ;;  %v513_v36 = vpack.c.bf16 %v81_v28, %v79_v24 }
  0x17   :  { %v19_v35 = vld [vmem:[%s1150_s0 + $0x8] sm:$0xff]  ;;  %v565_v38 = vpack.c.bf16 %v133_v30, %v131_v29  ;;  %v130_v39 = vld [vmem:[%s1152_s2 + $0x2c0] sm:$0xff]  ;;  %v132_v40 = vld [vmem:[%s1152_s2 + $0x2d0] sm:$0xff]  ;;  %v515_v44 = vpack.c.bf16 %v80_v33, %v78_v32 }
  0x18   :  { %556 = vmatpush1.bf16.msra.mxu0 %v555_v10  ;;  %v83_v37 = vld [vmem:[%s1152_s2 + $0x148] sm:$0xff]  ;;  %v85_v41 = vld [vmem:[%s1152_s2 + $0x158] sm:$0xff]  ;;  %250 = vmatprep.mubr.f32.mxu1 %v19_v35  ;;  %v82_v45 = vld [vmem:[%s1152_s2 + $0x140] sm:$0xff]  ;;  %v567_v46 = vpack.c.bf16 %v132_v40, %v130_v39 }
  0x19   :  { %500 = vmatpush1.bf16.msra.mxu1 %v499_v56  ;;  %558 = vmatprep.subr.bf16.mxu0 %v557_v13  ;;  %v135_v42 = vld [vmem:[%s1152_s2 + $0x2e8] sm:$0xff]  ;;  %v137_v43 = vld [vmem:[%s1152_s2 + $0x2f8] sm:$0xff]  ;;  %v517_v47 = vpack.c.bf16 %v85_v41, %v83_v37  ;;  %v84_v48 = vld [vmem:[%s1152_s2 + $0x150] sm:$0xff] }
  0x1a   :  { %502 = vmatprep.subr.bf16.mxu1 %v501_v61  ;;  %v569_v49 = vpack.c.bf16 %v137_v43, %v135_v42  ;;  %v134_v50 = vld [vmem:[%s1152_s2 + $0x2e0] sm:$0xff]  ;;  %v136_v51 = vld [vmem:[%s1152_s2 + $0x2f0] sm:$0xff]  ;;  %v87_v52 = vld [vmem:[%s1152_s2 + $0x168] sm:$0xff]  ;;  %v519_v54 = vpack.c.bf16 %v84_v48, %v82_v45 }
  0x1b   :  { %v89_v53 = vld [vmem:[%s1152_s2 + $0x178] sm:$0xff]  ;;  %v571_v55 = vpack.c.bf16 %v136_v51, %v134_v50  ;;  %v138_v56 = vld [vmem:[%s1151_s1] sm:$0xff]  ;;  %v140_v57 = vld [vmem:[%s1151_s1 + $0x10] sm:$0xff] }
  0x1c   :  { %560 = vmatpush1.bf16.msra.mxu0 %v559_v22  ;;  %v521_v58 = vpack.c.bf16 %v89_v53, %v87_v52  ;;  %v86_v59 = vld [vmem:[%s1152_s2 + $0x160] sm:$0xff]  ;;  %v88_v60 = vld [vmem:[%s1152_s2 + $0x170] sm:$0xff]  ;;  %v91_v61 = vld [vmem:[%s1152_s2 + $0x188] sm:$0xff]  ;;  %148 = vperm.xlu0 %610, %v138_v56  }
  0x1d   :  { %504 = vmatpush1.bf16.msra.mxu1 %v503_v6  ;;  %562 = vmatprep.subr.bf16.mxu0 %v561_v25  ;;  %v93_v62 = vld [vmem:[%s1152_s2 + $0x198] sm:$0xff] }
  0x1e   :  { %506 = vmatprep.subr.bf16.mxu1 %v505_v11  ;;  %158 = vperm.xlu1 %611, %v140_v57  }
  0x20   :  { %564 = vmatpush1.bf16.msra.mxu0 %v563_v34 }
  0x21   :  { %508 = vmatpush1.bf16.msra.mxu1 %v507_v19  ;;  %566 = vmatprep.subr.bf16.mxu0 %v565_v38 }
  0x22   :  { %510 = vmatprep.subr.bf16.mxu1 %v509_v23 }
  0x24   :  { %568 = vmatpush1.bf16.msra.mxu0 %v567_v46 }
  0x25   :  { %512 = vmatpush1.bf16.msra.mxu1 %v511_v31  ;;  %570 = vmatprep.subr.bf16.mxu0 %v569_v49 }
  0x26   :  { %514 = vmatprep.subr.bf16.mxu1 %v513_v36 }
  0x29   :  { %516 = vmatpush1.bf16.msra.mxu1 %v515_v44 }
  0x2a   :  { %518 = vmatprep.subr.bf16.mxu1 %v517_v47 }
  0x2b   :  { %9 = vsyncpa [#allocation3], 0  ;;  %v139_v63 = vld [vmem:[%s1151_s1 + $0x8] sm:$0xff]  ;;  %v141_v0 = vld [vmem:[%s1151_s1 + $0x18] sm:$0xff]  ;;  %v523_v1 = vpack.c.bf16 %v88_v60, %v86_v59  ;;  %572 = vmatpush1.bf16.msra.mxu0 %v571_v55  ;;  %v525_v3 = vpack.c.bf16 %v93_v62, %v91_v61  ;;  %vm445_vm0 = vcmask 556032   ;;  %s638_s7 = smov [#allocation2]  }
  0x2c   :  { %v20_v2 = vld [vmem:[%s1150_s0 + $0x10] sm:$0xff]  ;;  %v90_v4 = vld [vmem:[%s1152_s2 + $0x180] sm:$0xff]  ;;  %v95_v6 = vld [vmem:[%s1152_s2 + $0x1a8] sm:$0xff]  ;;  %153 = vperm.xlu0 %610, %v139_v63   ;;  %163 = vperm.xlu1 %611, %v141_v0   ;;  %s466_s8 = sshll.u32 %s638_s7, 4  ;;  %s467_s8 = int_to_ptr.vmem [resolvable:$true] %s466_s8 }
  0x2d   :  { %520 = vmatpush1.bf16.msra.mxu1 %v519_v54  ;;  %v92_v5 = vld [vmem:[%s1152_s2 + $0x190] sm:$0xff]  ;;  %v97_v8 = vld [vmem:[%s1152_s2 + $0x1b8] sm:$0xff]  ;;  %v143_v9 = vld [vmem:[%s1151_s1 + $0x28] sm:$0xff]  ;;  %s612_s11 = scalar_lea.vmem %s467_s8, 2048  ;;  %p617_p1 = scmp.lt.s32.totalorder %s467_s8, %s467_s8 }
  0x2e   :  { %522 = vmatprep.subr.bf16.mxu1 %v521_v58  ;;  %364 = vmatmul.mubr.f32.vlgmr.msra.gmra.mrb[0].mxu0 %v20_v2  ;;  %v142_v10 = vld [vmem:[%s1151_s1 + $0x20] sm:$0xff]  ;;  %v527_v11 = vpack.c.bf16 %v92_v5, %v90_v4  ;;  %v23_v12 = vld [vmem:[%s1150_s0 + $0x28] sm:$0xff]  ;;  %v529_v13 = vpack.c.bf16 %v97_v8, %v95_v6  ;;  %v96_v15 = vld [vmem:[%s1152_s2 + $0x1b0] sm:$0xff]  ;;  %p613_p0 = scmp.ne.s32.totalorder %s467_s8, %s612_s11  ;;  %p618_p2 = scmp.lt.s32.totalorder %s612_s11, %s612_s11 }
  0x2f   :  { %369 = vmatprep.mubr.f32.mxu0 %v636_v7  ;;  %v94_v14 = vld [vmem:[%s1152_s2 + $0x1a0] sm:$0xff]  ;;  %v99_v16 = vld [vmem:[%s1152_s2 + $0x1c8] sm:$0xff]  ;;  %v101_v17 = vld [vmem:[%s1152_s2 + $0x1d8] sm:$0xff] }
  0x30   :  { %173 = vperm.xlu1 %611, %v143_v9   ;;  %168 = vperm.xlu0 %610, %v142_v10   ;;  %v145_v18 = vld [vmem:[%s1151_s1 + $0x38] sm:$0xff]  ;;  %v144_v19 = vld [vmem:[%s1151_s1 + $0x30] sm:$0xff]  ;;  %v531_v20 = vpack.c.bf16 %v96_v15, %v94_v14  ;;  %v26_v21 = vld [vmem:[%s1150_s0 + $0x40] sm:$0xff]  ;;  %v533_v22 = vpack.c.bf16 %v101_v17, %v99_v16  ;;  %p619_p3 = por %p618_p2, %p617_p1 }
  0x31   :  { %524 = vmatpush1.bf16.msra.mxu1 %v523_v1  ;;  %v98_v23 = vld [vmem:[%s1152_s2 + $0x1c0] sm:$0xff]  ;;  %v100_v24 = vld [vmem:[%s1152_s2 + $0x1d0] sm:$0xff]  ;;  %v103_v25 = vld [vmem:[%s1152_s2 + $0x1e8] sm:$0xff] }
  0x32   :  { %526 = vmatprep.subr.bf16.mxu1 %v525_v3  ;;  %370 = vmatmul.mubr.f32.gmra.mrb[2].mxu0 %v23_v12  ;;  %v105_v26 = vld [vmem:[%s1152_s2 + $0x1f8] sm:$0xff]  ;;  %v535_v27 = vpack.c.bf16 %v100_v24, %v98_v23  ;;  %v102_v30 = vld [vmem:[%s1152_s2 + $0x1e0] sm:$0xff]  ;;  %v104_v31 = vld [vmem:[%s1152_s2 + $0x1f0] sm:$0xff]  ;;  %p620_p4 = pnand %p619_p3, %p613_p0 }
  0x33   :  { %375 = vmatprep.mubr.f32.mxu0 %v636_v7  ;;  %v29_v28 = vld [vmem:[%s1150_s0 + $0x58] sm:$0xff]  ;;  %v537_v29 = vpack.c.bf16 %v105_v26, %v103_v25  ;;  %v539_v32 = vpack.c.bf16 %v104_v31, %v102_v30  ;;  %v32_v33 = vld [vmem:[%s1150_s0 + $0x70] sm:$0xff]  ;;  %v18_v34 = vld [vmem:[%s1150_s0] sm:$0xff] }
  0x34   :  { %183 = vperm.xlu1 %611, %v145_v18   ;;  %178 = vperm.xlu0 %610, %v144_v19   ;;  %v35_v35 = vld [vmem:[%s1150_s0 + $0x88] sm:$0xff]  ;;  %v22_v36 = vld [vmem:[%s1150_s0 + $0x20] sm:$0xff]  ;;  %v21_v37 = vld [vmem:[%s1150_s0 + $0x18] sm:$0xff] }
  0x35   :  { %528 = vmatpush1.bf16.msra.mxu1 %v527_v11  ;;  %v38_v38 = vld [vmem:[%s1150_s0 + $0xa0] sm:$0xff]  ;;  %v25_v39 = vld [vmem:[%s1150_s0 + $0x38] sm:$0xff]  ;;  %v24_v40 = vld [vmem:[%s1150_s0 + $0x30] sm:$0xff] }
  0x36   :  { %530 = vmatprep.subr.bf16.mxu1 %v529_v13  ;;  %376 = vmatmul.mubr.f32.gmra.mrb[4].mxu0 %v26_v21  ;;  %v41_v41 = vld [vmem:[%s1150_s0 + $0xb8] sm:$0xff]  ;;  %v28_v42 = vld [vmem:[%s1150_s0 + $0x50] sm:$0xff]  ;;  %v27_v43 = vld [vmem:[%s1150_s0 + $0x48] sm:$0xff] }
  0x37   :  { %381 = vmatprep.mubr.f32.mxu0 %v636_v7  ;;  %v31_v44 = vld [vmem:[%s1150_s0 + $0x68] sm:$0xff]  ;;  %v34_v45 = vld [vmem:[%s1150_s0 + $0x80] sm:$0xff]  ;;  %v33_v46 = vld [vmem:[%s1150_s0 + $0x78] sm:$0xff] }
  0x38   :  { %v37_v47 = vld [vmem:[%s1150_s0 + $0x98] sm:$0xff]  ;;  %v36_v48 = vld [vmem:[%s1150_s0 + $0x90] sm:$0xff]  ;;  %v39_v50 = vld [vmem:[%s1150_s0 + $0xa8] sm:$0xff] }
  0x39   :  { %532 = vmatpush1.bf16.msra.mxu1 %v531_v20  ;;  %v40_v49 = vld [vmem:[%s1150_s0 + $0xb0] sm:$0xff]  ;;  %v412_v4 = vld [vmem:[%s1153_s3] sm:$0xff]  ;;  %v413_v8 = vld [vmem:[%s1153_s3 + $0x8] sm:$0xff] }
  0x3a   :  { %534 = vmatprep.subr.bf16.mxu1 %v533_v22  ;;  %382 = vmatmul.mubr.f32.gmra.mrb[6].mxu0 %v29_v28  ;;  %v414_v19 = vld [vmem:[%s1153_s3 + $0x10] sm:$0xff]  ;;  %v415_v21 = vld [vmem:[%s1153_s3 + $0x18] sm:$0xff]  ;;  %v416_v31 = vld [vmem:[%s1153_s3 + $0x20] sm:$0xff] }
  0x3b   :  { %387 = vmatprep.mubr.f32.mxu0 %v636_v7 }
  0x3d   :  { %536 = vmatpush1.bf16.msra.mxu1 %v535_v27 }
  0x3e   :  { %538 = vmatprep.subr.bf16.mxu1 %v537_v29  ;;  %388 = vmatmul.mubr.f32.gmra.mrb[8].mxu0 %v32_v33  ;;  %v417_v33 = vld [vmem:[%s1153_s3 + $0x28] sm:$0xff] }
  0x3f   :  { %393 = vmatprep.mubr.f32.mxu0 %v636_v7 }
  0x41   :  { %540 = vmatpush1.bf16.msra.mxu1 %v539_v32 }
  0x42   :  { %394 = vmatmul.mubr.f32.gmra.mrb[10].mxu0 %v35_v35 }
  0x43   :  { %399 = vmatprep.mubr.f32.mxu0 %v636_v7 }
  0x44   :  { %251 = vmatmul.mubr.f32.vlgmr.msra.gmra.mrb[0].mxu1 %v18_v34 }
  0x45   :  { %256 = vmatprep.mubr.f32.mxu1 %v22_v36 }
  0x46   :  { %400 = vmatmul.mubr.f32.gmra.mrb[12].mxu0 %v38_v38 }
  0x47   :  { %405 = vmatprep.mubr.f32.mxu0 %v636_v7  ;;  %v30_v7 = vld [vmem:[%s1150_s0 + $0x60] sm:$0xff] }
  0x48   :  { %257 = vmatmul.mubr.f32.gmra.mrb[2].mxu1 %v21_v37 }
  0x49   :  { %262 = vmatprep.mubr.f32.mxu1 %v25_v39 }
  0x4a   :  { %406 = vmatmul.mubr.f32.gmra.mrb[14].mxu0 %v41_v41 }
  0x4c   :  { %263 = vmatmul.mubr.f32.gmra.mrb[4].mxu1 %v24_v40 }
  0x4d   :  { %268 = vmatprep.mubr.f32.mxu1 %v28_v42  ;;  %v418_v42 = vld [vmem:[%s1153_s3 + $0x30] sm:$0xff] }
  0x50   :  { %269 = vmatmul.mubr.f32.gmra.mrb[6].mxu1 %v27_v43 }
  0x51   :  { %274 = vmatprep.mubr.f32.mxu1 %v31_v44  ;;  %v419_v44 = vld [vmem:[%s1153_s3 + $0x38] sm:$0xff] }
  0x54   :  { %275 = vmatmul.mubr.f32.gmra.mrb[8].mxu1 %v30_v7 }
  0x55   :  { %280 = vmatprep.mubr.f32.mxu1 %v34_v45 }
  0x58   :  { %281 = vmatmul.mubr.f32.gmra.mrb[10].mxu1 %v33_v46 }
  0x59   :  { %286 = vmatprep.mubr.f32.mxu1 %v37_v47 }
  0x5c   :  { %287 = vmatmul.mubr.f32.gmra.mrb[12].mxu1 %v36_v48 }
  0x5d   :  { %292 = vmatprep.mubr.f32.mxu1 %v40_v49 }
  0x60   :  { %293 = vmatmul.mubr.f32.gmra.mrb[14].mxu1 %v39_v50 }
  0x9b   :  { %v149_v59 = vpop.permute.xlu0 %148 }
  0x9d   :  { %v159_v17 = vpop.permute.xlu1 %158 }
  0xab   :  { %v154_v5 = vpop.permute.xlu0 %153  ;;  %v164_v34 = vpop.permute.xlu1 %163 }
  0xaf   :  { %v169_v7 = vpop.permute.xlu0 %168 }
 0x101   :  { %v365_v51 = vpop.f32.mrb[0].mxu0 }
 0x102   :  { %v367_v52 = vpop.f32.mrb[1].mxu0 }
 0x105   :  { %v371_v53 = vpop.f32.mrb[2].mxu0 }
 0x106   :  { %v373_v54 = vpop.f32.mrb[3].mxu0 }
 0x109   :  { %v377_v55 = vpop.f32.mrb[4].mxu0 }
 0x10a   :  { %v379_v56 = vpop.f32.mrb[5].mxu0 }
 0x10d   :  { %v383_v57 = vpop.f32.mrb[6].mxu0 }
 0x10e   :  { %v385_v58 = vpop.f32.mrb[7].mxu0 }
 0x111   :  { %v1058_v60 = vpop.f32.mrb[8].mxu0 }
 0x112   :  { %v1060_v61 = vpop.f32.mrb[9].mxu0 }
 0x115   :  { %v1062_v63 = vpop.f32.mrb[10].mxu0 }
 0x116   :  { %v1064_v2 = vpop.f32.mrb[11].mxu0 }
 0x117   :  { %v252_v62 = vpop.f32.mrb[0].mxu1 }
 0x118   :  { %v253_v0 = vadd.f32 %v252_v62, %v149_v59  ;;  %v254_v1 = vpop.f32.mrb[1].mxu1 }
 0x119   :  { %v255_v3 = vadd.f32 %v254_v1, %v149_v59  ;;  %v1072_v11 = vpop.f32.mrb[12].mxu0 }
 0x11a   :  { %v366_v6 = vadd.f32 %v365_v51, %v253_v0  ;;  %v1074_v15 = vpop.f32.mrb[13].mxu0 }
 0x11b   :  { %v368_v9 = vadd.f32 %v367_v52, %v255_v3  ;;  %v258_v10 = vpop.f32.mrb[2].mxu1  ;;  %v420_v52 = vld [vmem:[%s1153_s3 + $0x40] sm:$0xff]  ;;  %v422_v3 = vld [vmem:[%s1153_s3 + $0x50] sm:$0xff] }
 0x11c   :  { %v428_v12 = vadd.f32 %v412_v4, %v366_v6  ;;  %v259_v13 = vadd.f32 %v258_v10, %v154_v5  ;;  %v260_v14 = vpop.f32.mrb[3].mxu1  ;;  %v423_v4 = vld [vmem:[%s1153_s3 + $0x58] sm:$0xff] }
 0x11d   :  { %v429_v16 = vadd.f32 %v413_v8, %v368_v9  ;;  %v261_v18 = vadd.f32 %v260_v14, %v154_v5  ;;  %v1083_v24 = vpop.f32.mrb[14].mxu0  ;;  %v179_v5 = vpop.permute.xlu0 %178  ;;  %v424_v14 = vld [vmem:[%s1153_s3 + $0x60] sm:$0xff] }
 0x11e   :  { %444 = vst [vmem:[#allocation2] sm:$0xff] %v428_v12  ;;  %v372_v20 = vadd.f32 %v371_v53, %v259_v13  ;;  %v1085_v28 = vpop.f32.mrb[15].mxu0 }
 0x11f   :  { %446 = vst.msk [vmem:[#allocation2 + $0x8] sm:$0xff] %vm445_vm0, %v429_v16  ;;  %v374_v22 = vadd.f32 %v373_v54, %v261_v18  ;;  %v264_v23 = vpop.f32.mrb[4].mxu1  ;;  %v421_v54 = vld [vmem:[%s1153_s3 + $0x48] sm:$0xff] }
 0x120   :  { %v430_v25 = vadd.f32 %v414_v19, %v372_v20  ;;  %v265_v26 = vadd.f32 %v264_v23, %v159_v17  ;;  %v266_v27 = vpop.f32.mrb[5].mxu1  ;;  %v425_v16 = vld [vmem:[%s1153_s3 + $0x68] sm:$0xff] }
 0x121   :  { %v431_v29 = vadd.f32 %v415_v21, %v374_v22  ;;  %v267_v30 = vadd.f32 %v266_v27, %v159_v17 }
 0x122   :  { %447 = vst [vmem:[#allocation2 + $0x10] sm:$0xff] %v430_v25  ;;  %v378_v32 = vadd.f32 %v377_v55, %v265_v26  ;;  %v174_v55 = vpop.permute.xlu1 %173  ;;  %v426_v25 = vld [vmem:[%s1153_s3 + $0x70] sm:$0xff]  ;;  %v427_v26 = vld [vmem:[%s1153_s3 + $0x78] sm:$0xff] }
 0x123   :  { %448 = vst.msk [vmem:[#allocation2 + $0x18] sm:$0xff] %vm445_vm0, %v431_v29  ;;  %v380_v35 = vadd.f32 %v379_v56, %v267_v30  ;;  %v270_v36 = vpop.f32.mrb[6].mxu1 }
 0x124   :  { %v432_v37 = vadd.f32 %v416_v31, %v378_v32  ;;  %v271_v38 = vadd.f32 %v270_v36, %v164_v34  ;;  %v272_v39 = vpop.f32.mrb[7].mxu1 }
 0x125   :  { %v433_v40 = vadd.f32 %v417_v33, %v380_v35  ;;  %v273_v41 = vadd.f32 %v272_v39, %v164_v34 }
 0x126   :  { %449 = vst [vmem:[#allocation2 + $0x20] sm:$0xff] %v432_v37  ;;  %v384_v43 = vadd.f32 %v383_v57, %v271_v38  ;;  %v184_v17 = vpop.permute.xlu1 %183 }
 0x127   :  { %450 = vst.msk [vmem:[#allocation2 + $0x28] sm:$0xff] %vm445_vm0, %v433_v40  ;;  %v386_v45 = vadd.f32 %v385_v58, %v273_v41  ;;  %v276_v46 = vpop.f32.mrb[8].mxu1 }
 0x128   :  { %v434_v47 = vadd.f32 %v418_v42, %v384_v43  ;;  %v277_v48 = vadd.f32 %v276_v46, %v169_v7  ;;  %v278_v49 = vpop.f32.mrb[9].mxu1 }
 0x129   :  { %v435_v50 = vadd.f32 %v419_v44, %v386_v45  ;;  %v279_v51 = vadd.f32 %v278_v49, %v169_v7 }
 0x12a   :  { %451 = vst [vmem:[#allocation2 + $0x30] sm:$0xff] %v434_v47  ;;  %v390_v53 = vadd.f32 %v1058_v60, %v277_v48 }
 0x12b   :  { %452 = vst.msk [vmem:[#allocation2 + $0x38] sm:$0xff] %vm445_vm0, %v435_v50  ;;  %v392_v56 = vadd.f32 %v1060_v61, %v279_v51  ;;  %v282_v57 = vpop.f32.mrb[10].mxu1 }
 0x12c   :  { %v436_v58 = vadd.f32 %v420_v52, %v390_v53  ;;  %v283_v59 = vadd.f32 %v282_v57, %v174_v55  ;;  %v284_v62 = vpop.f32.mrb[11].mxu1 }
 0x12d   :  { %v437_v0 = vadd.f32 %v421_v54, %v392_v56  ;;  %v285_v1 = vadd.f32 %v284_v62, %v174_v55 }
 0x12e   :  { %453 = vst [vmem:[#allocation2 + $0x40] sm:$0xff] %v436_v58  ;;  %v396_v60 = vadd.f32 %v1062_v63, %v283_v59 }
 0x12f   :  { %454 = vst.msk [vmem:[#allocation2 + $0x48] sm:$0xff] %vm445_vm0, %v437_v0  ;;  %v398_v61 = vadd.f32 %v1064_v2, %v285_v1  ;;  %v288_v6 = vpop.f32.mrb[12].mxu1 }
 0x130   :  { %v438_v8 = vadd.f32 %v422_v3, %v396_v60  ;;  %v289_v9 = vadd.f32 %v288_v6, %v179_v5  ;;  %v290_v10 = vpop.f32.mrb[13].mxu1 }
 0x131   :  { %v439_v12 = vadd.f32 %v423_v4, %v398_v61  ;;  %v291_v13 = vadd.f32 %v290_v10, %v179_v5 }
 0x132   :  { %455 = vst [vmem:[#allocation2 + $0x50] sm:$0xff] %v438_v8  ;;  %v402_v63 = vadd.f32 %v1072_v11, %v289_v9 }
 0x133   :  { %456 = vst.msk [vmem:[#allocation2 + $0x58] sm:$0xff] %vm445_vm0, %v439_v12  ;;  %v404_v2 = vadd.f32 %v1074_v15, %v291_v13  ;;  %v294_v18 = vpop.f32.mrb[14].mxu1 }
 0x134   :  { %v440_v19 = vadd.f32 %v424_v14, %v402_v63  ;;  %v295_v20 = vadd.f32 %v294_v18, %v184_v17  ;;  %v296_v21 = vpop.f32.mrb[15].mxu1 }
 0x135   :  { %v441_v22 = vadd.f32 %v425_v16, %v404_v2  ;;  %v297_v23 = vadd.f32 %v296_v21, %v184_v17 }
 0x136   :  { %457 = vst [vmem:[#allocation2 + $0x60] sm:$0xff] %v440_v19  ;;  %v408_v11 = vadd.f32 %v1083_v24, %v295_v20 }
 0x137   :  { %458 = vst.msk [vmem:[#allocation2 + $0x68] sm:$0xff] %vm445_vm0, %v441_v22  ;;  %v410_v15 = vadd.f32 %v1085_v28, %v297_v23 }
 0x138   :  { %v442_v27 = vadd.f32 %v426_v25, %v408_v11 }
 0x139   :  { %v443_v29 = vadd.f32 %v427_v26, %v410_v15 }
 0x13a   :  { %459 = vst [vmem:[#allocation2 + $0x70] sm:$0xff] %v442_v27 }
 0x13b   :  { %460 = vst.msk [vmem:[#allocation2 + $0x78] sm:$0xff] %vm445_vm0, %v443_v29 }
 0x13c   :  { %623 = shalt.err (!%p620_p4)
}
 0x13d   :  { %s624_s3 = scalar_lea.hbm %s1154_s4, 2048 }
 0x13e   :  { %p625_p5 = scmp.ne.s32.totalorder %s1154_s4, %s624_s3  ;;  %p628_p6 = scmp.lt.u32.totalorder %s624_s3, %s1154_s4 }
 0x140   :  { %p630_p7 = pnand %p628_p6, %p625_p5 }
 0x142   :  { %633 = shalt.err (!%p630_p7)
}
 0x143   :  { %s639_s17 = smov 256   ;;  %s640_s18 = smov 16  }
 0x144   :  { %472 = dma.vmem_to_hbm [thread:$0]  %s467_s8, 2048, %s1154_s4, [#allocation3], %s639_s17, %s639_s17, %s640_s18  }
 0x145   :  { %634 = dma.done.wait [#allocation3], 2048  }
 0x146   :  { %635 = vsyncadd [#allocation3], 4294965248 }
 0x147   :  { %476 = vsyncpa [#allocation3], 1 }

</bundles_post_ra>
